<compile_context>
chip_gen: v5e
topology: v5e:2x2
jax: 0.10.0
libtpu: 0.0.40
codegen_flags: <defaults>
</compile_context>

<pallas_src>
import functools

import jax
import jax.numpy as jnp
from jax import lax
from jax.experimental import pallas as pl
from jax.experimental.pallas import tpu as pltpu

MODEL_DTYPE = jnp.bfloat16  # stand-in for self.model.dtype


# ---------------------------------------------------------------------------
# Device-aware tiling / VMEM budgeting
# ---------------------------------------------------------------------------
def _tpu_generation() -> int:
    """Best-effort TPU generation from device_kind ('TPU v5 lite', 'TPU v6e', 'TPU7x', ...)."""
    try:
        kind = jax.devices()[0].device_kind
        digits = [c for c in str(kind) if c.isdigit()]
        return int(digits[0]) if digits else 0
    except Exception:
        return 0


_ROW_TILE_CANDIDATES = (512, 256, 128, 64, 32, 16, 8)


def _select_row_tile(M: int, gen: int) -> int:
    # v6e: tm=512 keeps the E stream above the ~650 FLOP/B compute:BW ratio.
    # v7x: tm=256 is already compute-bound (3.2 TB/s HBM); for small M split
    #      the row axis so the "parallel" grid axis has >= 2 steps (2 TCs/chip).
    # v5e: tm=256 is already compute-bound; bigger tiles only add VMEM pressure.
    target = 512 if gen == 6 else 256
    if M <= target:
        if gen >= 7 and M >= 32 and (M // 2) % 16 == 0:
            return M // 2
        return M
    for t in _ROW_TILE_CANDIDATES:
        if t <= target and M % t == 0:
            return t
    return target  # caller pads M up to a multiple of this


def _select_vocab_tile(V: int, gen: int) -> int:
    # tv=1024 on v6e/v7x halves the per-grid-step overhead; v5e stays at 512
    # (per-step MXU time already dwarfs the ~0.35us fixed overhead).
    target = 512 if (gen and gen <= 5) else 1024
    for t in (1024, 512, 256, 128):
        if t <= target and t <= V and V % t == 0:
            return t
    return V  # small or awkward vocab: one full-width tile


def _vmem_limit_bytes(*, gen, resident_in, streamed_in, out_tiled, out_resident,
                      scratch, temps):
    """Exact per-buffer VMEM request.

    Streamed inputs and per-(i, j) outputs are double-buffered by the pipeline.
    Resident blocks (index constant along the inner axis) are also counted at
    2x because pl.Buffered(1) is deliberately not used (portability)."""
    total = (2 * resident_in + 2 * streamed_in + 2 * out_tiled
             + 2 * out_resident + scratch + temps)
    total = int(total * 1.25) + (2 << 20)  # Mosaic internal scratch / semaphores margin
    cap = (40 << 20) if gen >= 7 else (96 << 20)
    return max(8 << 20, min(total, cap))


# ---------------------------------------------------------------------------
# Fused denoise kernels:
#   per (i, j) grid step, with x tile (tm, H) resident across the V axis and
#   the weight streamed in (tv, H) tiles:
#     s        = x @ E_j^T                      (contract on H, f32 on MXU)
#     logits_j = s.astype(model_dtype)          (optionally written -> forward().logits)
#     online softmax over j of logits_j.float() (running max / sum, f32)
#     acc     += rescale * exp(logits_j - m) @ E_j
#   at the last j: out = acc * reciprocal(sum)  (embed_logits result)
# ---------------------------------------------------------------------------
def _denoise_fused_kernel(x_ref, e_ref, logits_ref, out_ref, m_scr, l_scr, acc_scr):
    j = pl.program_id(1)

    @pl.when(j == 0)
    def _init():
        m_scr[...] = jnp.full(m_scr.shape, -jnp.inf, dtype=m_scr.dtype)
        l_scr[...] = jnp.zeros(l_scr.shape, dtype=l_scr.dtype)
        acc_scr[...] = jnp.zeros(acc_scr.shape, dtype=acc_scr.dtype)

    # Tied LM head on this vocab tile: (tm, H) x (tv, H) contracted on H
    # (transposed-RHS MXU matmul; no per-step XLU transpose of the weight).
    s = lax.dot_general(
        x_ref[...], e_ref[...],
        dimension_numbers=(((1,), (1,)), ((), ())),
        preferred_element_type=jnp.float32,
    )
    logits_bf = s.astype(logits_ref.dtype)     # model-dtype logits (forward().logits)
    logits_ref[...] = logits_bf

    # Online softmax on logits.float() across vocab tiles.
    # Only two live (tm, tv) f32 temps here: sb then p.
    sb = logits_bf.astype(jnp.float32)
    m_prev = m_scr[...]
    m_new = jnp.maximum(m_prev, jnp.max(sb, axis=-1, keepdims=True))
    alpha = jnp.exp(m_prev - m_new)            # 0 at j == 0 (m_prev = -inf)
    p = jnp.exp(sb - m_new)
    l_scr[...] = alpha * l_scr[...] + jnp.sum(p, axis=-1, keepdims=True)
    acc_scr[...] = alpha * acc_scr[...] + jnp.dot(
        p.astype(e_ref.dtype), e_ref[...], preferred_element_type=jnp.float32
    )
    m_scr[...] = m_new

    @pl.when(j == pl.num_programs(1) - 1)
    def _finalize():
        inv_l = pl.reciprocal(l_scr[...], approx=False)   # exact; (tm, 1) -> cheap
        out_ref[...] = (acc_scr[...] * inv_l).astype(out_ref.dtype)


def _denoise_fused_kernel_nologits(x_ref, e_ref, out_ref, m_scr, l_scr, acc_scr):
    """Logits-free variant for inner denoise iterations (no (M, V) HBM writeback)."""
    j = pl.program_id(1)

    @pl.when(j == 0)
    def _init():
        m_scr[...] = jnp.full(m_scr.shape, -jnp.inf, dtype=m_scr.dtype)
        l_scr[...] = jnp.zeros(l_scr.shape, dtype=l_scr.dtype)
        acc_scr[...] = jnp.zeros(acc_scr.shape, dtype=acc_scr.dtype)

    s = lax.dot_general(
        x_ref[...], e_ref[...],
        dimension_numbers=(((1,), (1,)), ((), ())),
        preferred_element_type=jnp.float32,
    )
    # Round through the model dtype so the math matches forward().logits -> softmax.
    sb = s.astype(MODEL_DTYPE).astype(jnp.float32)
    m_prev = m_scr[...]
    m_new = jnp.maximum(m_prev, jnp.max(sb, axis=-1, keepdims=True))
    alpha = jnp.exp(m_prev - m_new)
    p = jnp.exp(sb - m_new)
    l_scr[...] = alpha * l_scr[...] + jnp.sum(p, axis=-1, keepdims=True)
    acc_scr[...] = alpha * acc_scr[...] + jnp.dot(
        p.astype(e_ref.dtype), e_ref[...], preferred_element_type=jnp.float32
    )
    m_scr[...] = m_new

    @pl.when(j == pl.num_programs(1) - 1)
    def _finalize():
        inv_l = pl.reciprocal(l_scr[...], approx=False)
        out_ref[...] = (acc_scr[...] * inv_l).astype(out_ref.dtype)


@functools.partial(jax.jit, static_argnames=("tm", "tv", "return_logits"))
def denoise_flat(x, embed_weight, *, tm=None, tv=None, return_logits=True):
    """x: [M, H] model-dtype, embed_weight: [V, H].

    return_logits=True  -> (embeds [M, H], logits [M, V])   (forward + embed_logits)
    return_logits=False -> embeds [M, H]                    (module.denoise hot path)
    """
    M, H = x.shape
    V, H2 = embed_weight.shape
    assert H == H2
    gen = _tpu_generation()

    if tv is None or V % tv != 0:
        tv = _select_vocab_tile(V, gen)
    tv = min(tv, V)
    if tm is None:
        tm = _select_row_tile(M, gen)
    tm = min(tm, M)

    # Ragged M: pad with zero rows (computed, then sliced away).
    M_pad = -(-M // tm) * tm
    x_p = x if M_pad == M else jnp.pad(x, ((0, M_pad - M), (0, 0)))

    isz = jnp.dtype(MODEL_DTYPE).itemsize
    vmem = _vmem_limit_bytes(
        gen=gen,
        resident_in=tm * H * isz,                       # x tile (constant along j)
        streamed_in=tv * H * isz,                       # E tile
        out_tiled=(tm * tv * isz) if return_logits else 0,
        out_resident=tm * H * isz,                      # embeds tile
        scratch=tm * H * 4 + 2 * tm * 128 * 4,          # acc + (tm,1) m/l (lane-padded)
        temps=3 * tm * tv * 4,                          # in-body f32 (tm, tv) temps
    )

    grid = (M_pad // tm, V // tv)
    x_spec = pl.BlockSpec((tm, H), lambda i, j: (i, 0))     # resident across V
    e_spec = pl.BlockSpec((tv, H), lambda i, j: (j, 0))     # streamed over V
    emb_spec = pl.BlockSpec((tm, H), lambda i, j: (i, 0))   # resident over V
    scratch = [
        pltpu.VMEM((tm, 1), jnp.float32),   # running max
        pltpu.VMEM((tm, 1), jnp.float32),   # running sum
        pltpu.VMEM((tm, H), jnp.float32),   # probs @ E accumulator
    ]
    cparams = pltpu.CompilerParams(
        dimension_semantics=("parallel", "arbitrary"),
        vmem_limit_bytes=vmem,
    )

    if return_logits:
        logits, embeds = pl.pallas_call(
            _denoise_fused_kernel,
            out_shape=(
                jax.ShapeDtypeStruct((M_pad, V), MODEL_DTYPE),
                jax.ShapeDtypeStruct((M_pad, H), MODEL_DTYPE),
            ),
            grid_spec=pltpu.PrefetchScalarGridSpec(
                num_scalar_prefetch=0,
                grid=grid,
                in_specs=[x_spec, e_spec],
                out_specs=(
                    pl.BlockSpec((tm, tv), lambda i, j: (i, j)),  # logits tile
                    emb_spec,
                ),
                scratch_shapes=scratch,
            ),
            compiler_params=cparams,
        )(x_p, embed_weight)
        return embeds[:M], logits[:M]

    embeds = pl.pallas_call(
        _denoise_fused_kernel_nologits,
        out_shape=jax.ShapeDtypeStruct((M_pad, H), MODEL_DTYPE),
        grid_spec=pltpu.PrefetchScalarGridSpec(
            num_scalar_prefetch=0,
            grid=grid,
            in_specs=[x_spec, e_spec],
            out_specs=emb_spec,
            scratch_shapes=scratch,
        ),
        compiler_params=cparams,
    )(x_p, embed_weight)
    return embeds[:M]


def denoise(inputs_embeds, embed_weight, *, tm=None, tv=None, return_logits=False):
    """inputs_embeds: [B, S, H] -> new_embeds [B, S, H] (and logits [B, S, V] if requested)."""
    B, S, H = inputs_embeds.shape
    V = embed_weight.shape[0]
    flat = inputs_embeds.reshape(B * S, H)
    if return_logits:
        embeds, logits = denoise_flat(flat, embed_weight, tm=tm, tv=tv, return_logits=True)
        return embeds.reshape(B, S, H), logits.reshape(B, S, V)
    embeds = denoise_flat(flat, embed_weight, tm=tm, tv=tv, return_logits=False)
    return embeds.reshape(B, S, H)


# ---------------------------------------------------------------------------
# Standalone embed_logits (used by generate() to init the thinking embeds from
# random logits). Same V-tiled online softmax; the logits arrive as an input.
# ---------------------------------------------------------------------------
def _embed_logits_kernel(lg_ref, e_ref, out_ref, m_scr, l_scr, acc_scr):
    j = pl.program_id(1)

    @pl.when(j == 0)
    def _init():
        m_scr[...] = jnp.full(m_scr.shape, -jnp.inf, dtype=m_scr.dtype)
        l_scr[...] = jnp.zeros(l_scr.shape, dtype=l_scr.dtype)
        acc_scr[...] = jnp.zeros(acc_scr.shape, dtype=acc_scr.dtype)

    sb = lg_ref[...].astype(jnp.float32)       # logits.float()
    m_prev = m_scr[...]
    m_new = jnp.maximum(m_prev, jnp.max(sb, axis=-1, keepdims=True))
    alpha = jnp.exp(m_prev - m_new)
    p = jnp.exp(sb - m_new)
    l_scr[...] = alpha * l_scr[...] + jnp.sum(p, axis=-1, keepdims=True)
    acc_scr[...] = alpha * acc_scr[...] + jnp.dot(
        p.astype(e_ref.dtype), e_ref[...], preferred_element_type=jnp.float32
    )
    m_scr[...] = m_new

    @pl.when(j == pl.num_programs(1) - 1)
    def _finalize():
        inv_l = pl.reciprocal(l_scr[...], approx=False)
        out_ref[...] = (acc_scr[...] * inv_l).astype(out_ref.dtype)


@functools.partial(jax.jit, static_argnames=("tm", "tv"))
def embed_logits(logits, embed_weight, *, tm=None, tv=None):
    """logits: [M, V] model-dtype, embed_weight: [V, H] -> embeds [M, H]."""
    M, V = logits.shape
    V2, H = embed_weight.shape
    assert V == V2
    gen = _tpu_generation()

    if tv is None or V % tv != 0:
        tv = _select_vocab_tile(V, gen)
    tv = min(tv, V)
    if tm is None:
        tm = _select_row_tile(M, gen)
    tm = min(tm, M)

    M_pad = -(-M // tm) * tm
    lg = logits if M_pad == M else jnp.pad(logits, ((0, M_pad - M), (0, 0)))

    isz = jnp.dtype(MODEL_DTYPE).itemsize
    vmem = _vmem_limit_bytes(
        gen=gen,
        resident_in=0,
        streamed_in=tm * tv * isz + tv * H * isz,
        out_tiled=0,
        out_resident=tm * H * isz,
        scratch=tm * H * 4 + 2 * tm * 128 * 4,
        temps=2 * tm * tv * 4,
    )

    out = pl.pallas_call(
        _embed_logits_kernel,
        out_shape=jax.ShapeDtypeStruct((M_pad, H), MODEL_DTYPE),
        grid_spec=pltpu.PrefetchScalarGridSpec(
            num_scalar_prefetch=0,
            grid=(M_pad // tm, V // tv),
            in_specs=[
                pl.BlockSpec((tm, tv), lambda i, j: (i, j)),  # logits tile
                pl.BlockSpec((tv, H), lambda i, j: (j, 0)),   # weight streamed over V
            ],
            out_specs=pl.BlockSpec((tm, H), lambda i, j: (i, 0)),
            scratch_shapes=[
                pltpu.VMEM((tm, 1), jnp.float32),
                pltpu.VMEM((tm, 1), jnp.float32),
                pltpu.VMEM((tm, H), jnp.float32),
            ],
        ),
        compiler_params=pltpu.CompilerParams(
            dimension_semantics=("parallel", "arbitrary"),
            vmem_limit_bytes=vmem,
        ),
    )(lg, embed_weight)
    return out[:M]


# ---------------------------------------------------------------------------
# Pure-JAX references for correctness check.
# ---------------------------------------------------------------------------
def denoise_ref(inputs_embeds, embed_weight):
    x = inputs_embeds.astype(jnp.float32)
    w = embed_weight.astype(jnp.float32)
    logits = (x @ w.T).astype(MODEL_DTYPE)
    probs = jax.nn.softmax(logits.astype(jnp.float32), axis=-1).astype(MODEL_DTYPE)
    out = (probs.astype(jnp.float32) @ w).astype(MODEL_DTYPE)
    return out, logits


def embed_logits_ref(logits, embed_weight):
    w = embed_weight.astype(jnp.float32)
    probs = jax.nn.softmax(logits.astype(jnp.float32), axis=-1).astype(MODEL_DTYPE)
    return (probs.astype(jnp.float32) @ w).astype(MODEL_DTYPE)


if __name__ == "__main__":
    # Small, TPU-tile-friendly synthetic config.  Explicit TM=16 / TV=256 gives
    # 2 row tiles and 2 vocab tiles so the online-softmax accumulation path and
    # the multi-step grid are actually exercised; a second call uses the
    # device-aware auto-tiling path.
    B, S, H, V = 2, 16, 128, 512      # batch, "thinking" seq, hidden, vocab
    TM, TV = 16, 256
    key = jax.random.PRNGKey(0)
    k_emb, k_noise = jax.random.split(key)

    # Deterministic synthetic parameters (stand-in for model.embed_tokens.weight).
    embed_weight = (
        jax.random.normal(k_emb, (V, H), dtype=jnp.float32) * 0.02
    ).astype(MODEL_DTYPE)

    # generate() initializes thinking embeds as embed_logits(randn(B, S, V)).
    init_logits = jax.random.normal(k_noise, (B, S, V), dtype=jnp.float32).astype(
        MODEL_DTYPE
    )
    inputs_embeds = embed_logits(
        init_logits.reshape(B * S, V), embed_weight, tm=TM, tv=TV
    )
    inputs_embeds = jax.block_until_ready(inputs_embeds).reshape(B, S, H)

    # Check the init path against the plain-JAX reference.
    init_ref = embed_logits_ref(init_logits.reshape(B * S, V), embed_weight)
    assert jnp.allclose(
        inputs_embeds.reshape(B * S, H).astype(jnp.float32),
        init_ref.astype(jnp.float32),
        atol=2e-2, rtol=2e-2,
    )

    # One denoising step through the fused Pallas kernel (with logits, i.e.
    # forward() + embed_logits()).
    out_embeds, logits = denoise(
        inputs_embeds, embed_weight, tm=TM, tv=TV, return_logits=True
    )
    out_embeds = jax.block_until_ready(out_embeds)
    logits = jax.block_until_ready(logits)

    # Inner-loop logits-free variant (the module.denoise() hot path).
    out_embeds_nl = denoise(
        inputs_embeds, embed_weight, tm=TM, tv=TV, return_logits=False
    )
    out_embeds_nl = jax.block_until_ready(out_embeds_nl)

    # Device-aware auto-tiled call.
    out_embeds_auto = denoise(inputs_embeds, embed_weight, return_logits=False)
    out_embeds_auto = jax.block_until_ready(out_embeds_auto)

    # Sanity-check against the plain-JAX reference (bf16 tolerance).
    ref_embeds, ref_logits = denoise_ref(inputs_embeds, embed_weight)
    assert out_embeds.shape == (B, S, H) and out_embeds.dtype == MODEL_DTYPE
    assert logits.shape == (B, S, V) and logits.dtype == MODEL_DTYPE
    for got in (out_embeds, out_embeds_nl, out_embeds_auto):
        assert got.shape == (B, S, H) and got.dtype == MODEL_DTYPE
        assert jnp.allclose(
            got.astype(jnp.float32), ref_embeds.astype(jnp.float32),
            atol=2e-2, rtol=2e-2,
        )
    assert jnp.allclose(
        logits.astype(jnp.float32), ref_logits.astype(jnp.float32),
        atol=2e-2, rtol=2e-2,
    )

    print("KERNEL_OK")
</pallas_src>

<mosaic_0001>
module attributes {stable_mosaic.version = 11 : i64} {
  func.func @_embed_logits_kernel(%arg0: i32, %arg1: i32, %arg2: memref<16x256xbf16, #tpu.memory_space<vmem>>, %arg3: memref<256x128xbf16, #tpu.memory_space<vmem>>, %arg4: memref<16x128xbf16, #tpu.memory_space<vmem>>, %arg5: memref<16x1xf32, #tpu.memory_space<vmem>>, %arg6: memref<16x1xf32, #tpu.memory_space<vmem>>, %arg7: memref<16x128xf32, #tpu.memory_space<vmem>>) attributes {dimension_semantics = [#tpu.dimension_semantics<parallel>, #tpu.dimension_semantics<arbitrary>], iteration_bounds = array<i64: 2, 2>, scalar_prefetch = 0 : i64, scratch_operands = 3 : i64, tpu.core_type = #tpu.core_type<tc>, window_params = [{transform_indices = @transform_0, window_bounds = array<i64: 16, 256>}, {transform_indices = @transform_1, window_bounds = array<i64: 256, 128>}, {transform_indices = @transform_2, window_bounds = array<i64: 16, 128>}]} {
    %c0_i32 = arith.constant 0 : i32
    %0 = arith.cmpi eq, %arg1, %c0_i32 : i32
    %1 = arith.extui %0 : i1 to i32
    %c0_i32_0 = arith.constant 0 : i32
    %2 = arith.cmpi ne, %1, %c0_i32_0 : i32
    scf.if %2 {
      %cst_19 = arith.constant 0xFF800000 : f32
      %32 = vector.broadcast %cst_19 : f32 to vector<16x1xf32>
      %c0_20 = arith.constant 0 : index
      %c0_21 = arith.constant 0 : index
      %33 = vector.load %arg5[%c0_20, %c0_21] : memref<16x1xf32, #tpu.memory_space<vmem>>, vector<16x1xf32>
      tpu.vector_store %arg5[%c0_20, %c0_21], %32 {strides = array<i32>} : memref<16x1xf32, #tpu.memory_space<vmem>>, vector<16x1xf32>,
      %cst_22 = arith.constant 0.000000e+00 : f32
      %34 = vector.broadcast %cst_22 : f32 to vector<16x1xf32>
      %c0_23 = arith.constant 0 : index
      %c0_24 = arith.constant 0 : index
      %35 = vector.load %arg6[%c0_23, %c0_24] : memref<16x1xf32, #tpu.memory_space<vmem>>, vector<16x1xf32>
      tpu.vector_store %arg6[%c0_23, %c0_24], %34 {strides = array<i32>} : memref<16x1xf32, #tpu.memory_space<vmem>>, vector<16x1xf32>,
      %cst_25 = arith.constant 0.000000e+00 : f32
      %36 = vector.broadcast %cst_25 : f32 to vector<16x128xf32>
      %c0_26 = arith.constant 0 : index
      %c0_27 = arith.constant 0 : index
      %37 = vector.load %arg7[%c0_26, %c0_27] : memref<16x128xf32, #tpu.memory_space<vmem>>, vector<16x128xf32>
      tpu.vector_store %arg7[%c0_26, %c0_27], %36 {strides = array<i32>} : memref<16x128xf32, #tpu.memory_space<vmem>>, vector<16x128xf32>,
    } else {
    }
    %c0 = arith.constant 0 : index
    %c0_1 = arith.constant 0 : index
    %3 = vector.load %arg2[%c0, %c0_1] : memref<16x256xbf16, #tpu.memory_space<vmem>>, vector<16x256xbf16>
    %4 = arith.extf %3 : vector<16x256xbf16> to vector<16x256xf32>
    %c0_2 = arith.constant 0 : index
    %c0_3 = arith.constant 0 : index
    %5 = vector.load %arg5[%c0_2, %c0_3] : memref<16x1xf32, #tpu.memory_space<vmem>>, vector<16x1xf32>
    %cst = arith.constant dense<0xFF800000> : vector<16xf32>
    %6 = vector.multi_reduction <maximumf>, %4, %cst [1] : vector<16x256xf32> to vector<16xf32>
    %7 = vector.shape_cast %6 : vector<16xf32> to vector<16x1xf32>
    %8 = arith.maximumf %5, %7 : vector<16x1xf32>
    %9 = arith.subf %5, %8 : vector<16x1xf32>
    %10 = math.exp %9 : vector<16x1xf32>
    %11 = vector.broadcast %8 : vector<16x1xf32> to vector<16x256xf32>
    %12 = arith.subf %4, %11 : vector<16x256xf32>
    %13 = math.exp %12 : vector<16x256xf32>
    %c0_4 = arith.constant 0 : index
    %c0_5 = arith.constant 0 : index
    %14 = vector.load %arg6[%c0_4, %c0_5] : memref<16x1xf32, #tpu.memory_space<vmem>>, vector<16x1xf32>
    %15 = arith.mulf %10, %14 : vector<16x1xf32>
    %cst_6 = arith.constant dense<0.000000e+00> : vector<16xf32>
    %16 = vector.multi_reduction <add>, %13, %cst_6 [1] : vector<16x256xf32> to vector<16xf32>
    %17 = vector.shape_cast %16 : vector<16xf32> to vector<16x1xf32>
    %18 = arith.addf %15, %17 : vector<16x1xf32>
    %c0_7 = arith.constant 0 : index
    %c0_8 = arith.constant 0 : index
    %19 = vector.load %arg6[%c0_7, %c0_8] : memref<16x1xf32, #tpu.memory_space<vmem>>, vector<16x1xf32>
    tpu.vector_store %arg6[%c0_7, %c0_8], %18 {strides = array<i32>} : memref<16x1xf32, #tpu.memory_space<vmem>>, vector<16x1xf32>,
    %c0_9 = arith.constant 0 : index
    %c0_10 = arith.constant 0 : index
    %20 = vector.load %arg7[%c0_9, %c0_10] : memref<16x128xf32, #tpu.memory_space<vmem>>, vector<16x128xf32>
    %21 = vector.broadcast %10 : vector<16x1xf32> to vector<16x128xf32>
    %22 = arith.mulf %21, %20 : vector<16x128xf32>
    %23 = arith.truncf %13 : vector<16x256xf32> to vector<16x256xbf16>
    %c0_11 = arith.constant 0 : index
    %c0_12 = arith.constant 0 : index
    %24 = vector.load %arg3[%c0_11, %c0_12] : memref<256x128xbf16, #tpu.memory_space<vmem>>, vector<256x128xbf16>
    %cst_13 = arith.constant dense<0.000000e+00> : vector<16x128xf32>
    %25 = tpu.matmul %23, %24, %cst_13 {dimension_numbers = #tpu.dot_dimension_numbers<[1], [0], [0], [1], [0, 0, 1, 1], [], []>} : vector<16x256xbf16>, vector<256x128xbf16>, vector<16x128xf32> -> vector<16x128xf32>
    %26 = arith.addf %22, %25 : vector<16x128xf32>
    %c0_14 = arith.constant 0 : index
    %c0_15 = arith.constant 0 : index
    %27 = vector.load %arg7[%c0_14, %c0_15] : memref<16x128xf32, #tpu.memory_space<vmem>>, vector<16x128xf32>
    tpu.vector_store %arg7[%c0_14, %c0_15], %26 {strides = array<i32>} : memref<16x128xf32, #tpu.memory_space<vmem>>, vector<16x128xf32>,
    %c0_16 = arith.constant 0 : index
    %c0_17 = arith.constant 0 : index
    %28 = vector.load %arg5[%c0_16, %c0_17] : memref<16x1xf32, #tpu.memory_space<vmem>>, vector<16x1xf32>
    tpu.vector_store %arg5[%c0_16, %c0_17], %8 {strides = array<i32>} : memref<16x1xf32, #tpu.memory_space<vmem>>, vector<16x1xf32>,
    %c1_i32 = arith.constant 1 : i32
    %29 = arith.cmpi eq, %arg1, %c1_i32 : i32
    %30 = arith.extui %29 : i1 to i32
    %c0_i32_18 = arith.constant 0 : i32
    %31 = arith.cmpi ne, %30, %c0_i32_18 : i32
    scf.if %31 {
      %c0_19 = arith.constant 0 : index
      %c0_20 = arith.constant 0 : index
      %32 = vector.load %arg6[%c0_19, %c0_20] : memref<16x1xf32, #tpu.memory_space<vmem>>, vector<16x1xf32>
      %33 = tpu.reciprocal %32 : vector<16x1xf32> -> vector<16x1xf32>
      %c0_21 = arith.constant 0 : index
      %c0_22 = arith.constant 0 : index
      %34 = vector.load %arg7[%c0_21, %c0_22] : memref<16x128xf32, #tpu.memory_space<vmem>>, vector<16x128xf32>
      %35 = vector.broadcast %33 : vector<16x1xf32> to vector<16x128xf32>
      %36 = arith.mulf %34, %35 : vector<16x128xf32>
      %37 = arith.truncf %36 : vector<16x128xf32> to vector<16x128xbf16>
      %c0_23 = arith.constant 0 : index
      %c0_24 = arith.constant 0 : index
      %38 = vector.load %arg4[%c0_23, %c0_24] : memref<16x128xbf16, #tpu.memory_space<vmem>>, vector<16x128xbf16>
      tpu.vector_store %arg4[%c0_23, %c0_24], %37 {strides = array<i32>} : memref<16x128xbf16, #tpu.memory_space<vmem>>, vector<16x128xbf16>,
    } else {
    }
    return
  }
  func.func @transform_0(%arg0: i32, %arg1: i32) -> (i32, i32) {
    %c0_i32 = arith.constant 0 : i32
    return %arg0, %arg1 : i32, i32
  }
  func.func @transform_1(%arg0: i32, %arg1: i32) -> (i32, i32) {
    %c0_i32 = arith.constant 0 : i32
    %c0_i32_0 = arith.constant 0 : i32
    return %arg1, %c0_i32 : i32, i32
  }
  func.func @transform_2(%arg0: i32, %arg1: i32) -> (i32, i32) {
    %c0_i32 = arith.constant 0 : i32
    %c0_i32_0 = arith.constant 0 : i32
    return %arg0, %c0_i32 : i32, i32
  }
}

</mosaic_0001>

<bundles_post_ra>
// kernel: embed_logits.1
= control target key start
LH: loop header
LB: loop body
LE: loop exit
PB: predicated region body
PF: predicated region fallthrough
CT: control target
= control target key end

     0   :  { %s1482_s0 = inlined_call_operand.hbm [shape: bf16[32,512], index: 0, kind: input, shape index: {}]   ;;  %s1483_s1 = inlined_call_operand.hbm [shape: bf16[512,128], index: 1, kind: input, shape index: {}]   ;;  %s1484_s2 = inlined_call_operand.hbm [shape: bf16[32,128], index: 2, kind: output, shape index: {}]  }
   0x1   :  { %1491 = sst [smem:[#allocation20_spill]] %s1482_s0 }
   0x2   :  { %1492 = sst [smem:[#allocation21_spill]] %s1484_s2 }
   0x3   :  { %7 = vsyncpa [#allocation6], 0 }
   0x4   :  { %9 = vsyncpa [#allocation6 + $0x1], 0 }
   0x5   :  { %10 = vsyncpa [#allocation9], 0 }
   0x6   :  { %12 = vsyncpa [#allocation9 + $0x1], 0 }
   0x7   :  { %13 = vsyncpa [#allocation7], 0 }
   0x8   :  { %15 = vsyncpa [#allocation7 + $0x1], 0  ;;  %s1164_s9 = smov 0   ;;  %s1166_s10 = smov 0  }
   0x9   :  { %s1168_s11 = smov 0   ;;  %s1170_s12 = smov 0  }
   0xa   :  { %s1172_s13 = smov 0   ;;  %s1174_s14 = smov 0  }
   0xb   :  { %s1176_s15 = smov 0   ;;  %s1178_s16 = smov 0  }
   0xc   :  { %s1180_s17 = smov 0   ;;  %s1182_s18 = smov 0  }
   0xd   :  { %s1184_s19 = smov 0   ;;  %s1186_s20 = smov 0  }
   0xe   :  { %s1188_s21 = smov 0   ;;  %s1190_s22 = smov 0  }
   0xf LB: > { %1493 = sst [smem:[#allocation14_spill]] %s1120_s18  ;;  %s30_s23 = sadd.s32 1, %s1128_s20  ;;  %s1136_s22 = sphi %s1190_s22, %s21_s22   ;;  %s1132_s21 = sphi %s1188_s21, %s1516_s21   ;;  %s1128_s20 = sphi %s1186_s20, %s1515_s20   ;;  %s1124_s19 = sphi %s1184_s19, %s1514_s19   ;;  %s1120_s18 = sphi %s1182_s18, %s1513_s18   ;;  %s1116_s17 = sphi %s1180_s17, %s1525_s17   ;;  %s1112_s16 = sphi %s1178_s16, %s1524_s16   ;;  %s1108_s15 = sphi %s1176_s15, %s1523_s15   ;;  %s1104_s14 = sphi %s1174_s14, %s1522_s14   ;;  %s1100_s13 = sphi %s1172_s13, %s1521_s13   ;;  %s1096_s12 = sphi %s1170_s12, %s1520_s12   ;;  %s1092_s11 = sphi %s1168_s11, %s1519_s11   ;;  %s1088_s10 = sphi %s1166_s10, %s1518_s10   ;;  %s1084_s9 = sphi %s1164_s9, %s1517_s9  }
  0x10   : > { %1494 = sst [smem:[#allocation15_spill]] %s1124_s19  ;;  %s33_s24 = sadd.s32 1, %s1132_s21 }
  0x11   : > { %1495 = sst [smem:[#allocation16_spill]] %s1128_s20  ;;  %p31_p0 = scmp.ge.s32.totalorder %s30_s23, 2 }
  0x12   : > { %1496 = sst [smem:[#allocation17_spill]] %s1132_s21  ;;  %s42_s25 = sadd.s32 1, %s1116_s17 }
  0x13   : > { %p49_p1 = scmp.ne.s32.totalorder %s1116_s17, %s1112_s16  ;;  %p50_p2 = scmp.eq.s32.totalorder %s1136_s22, 0 }
  0x14   : > { %s1527_s23 = smov (%p31_p0, %s30_s23), 0  ;;  %s1529_s24 = smov (!%p31_p0, %s33_s24), %s1132_s21 }
  0x15   : > { %1497 = sst [smem:[#allocation18_spill]] %s1527_s23  ;;  %s1245_s26 = ssub.s32 %s1128_s20, %s1527_s23 }
  0x16   : > { %p1249_p3 = por %p50_p2, %p49_p1  ;;  %p35_p4 = scmp.ge.s32.totalorder %s1529_s24, 2 }
  0x17   : > { %p55_p5 = scmp.ne.s32.totalorder %s1112_s16, %s1108_s15  ;;  %s94_s28 = sadd.s32 1, %s1092_s11 }
  0x18   : > { %s1531_s24 = smov (%p35_p4, %s1529_s24), 0  ;;  %p1487_p6 = scmp.lt.s32.totalorder %s1136_s22, 4 }
  0x19   : > { %1499 = sst [smem:[#allocation19_spill]] %s1531_s24  ;;  %s131_s29 = sand.u32 1, %s1116_s17  }
  0x1a   : > { %s37_s30 = ssub.s32 %s1132_s21, %s1531_s24  ;;  %s657_s4 = sshll.u32 %s131_s29, 4 }
  0x1b   : > { %s39_s3 = sor.u32 %s1245_s26, %s37_s30  ;;  %p92_p7 = scmp.eq.s32.totalorder %s37_s30, 0 }
  0x1c   : > { %p40_p8 = scmp.eq.s32.totalorder %s39_s3, 0  ;;  %s659_s7 = sshll.u32 %s1128_s20, 1 }
  0x1d   : > { %s1264_s5 = scalar_select %p92_p7, %s1092_s11, %s94_s28  }
  0x1e   : > { %s1267_s6 = scalar_select %p40_p8, %s1116_s17, %s42_s25  }
  0x1f   : > { %s740_s8 = sshll.u32 %s1132_s21, 3  ;;  %s135_s23 = scalar_lea.vmem [#allocation5], %s657_s4 }
  0x20   : > { %s146_s2 = sshll.u32 %s135_s23, 4  ;;  %s141_s19 = sadd.s32 %s740_s8, %s659_s7  ;;  %s147_s2 = int_to_ptr.vmem [resolvable:$true] %s146_s2 }
  0x21   : > { %s661_s18 = sshll.u32 %s141_s19, 2  ;;  %p771_p9 = pnand %p1487_p6, %p1249_p3 }
  0x22   : > { %s1500_s0 = sld [smem:[#allocation20_spill]]  ;;  %p665_p10 = scmp.ge.s32.totalorder %s1136_s22, 1 }
  0x23   : > { %s132_s19 = scalar_lea.sflag [#allocation6], %s131_s29  ;;  %s1138_s23 = smov 256  }
  0x24   : > { %s1139_s27 = smov 128   ;;  %s1140_s4 = smov 8  }
  0x25   : > { %p176_p11 = scmp.lt.s32.totalorder %s1136_s22, 5  ;;  %s653_s7 = sadd.s32 4294967295, %s1136_s22  }
  0x26   : > { %s654_s8 = sadd.s32 4294967294, %s1136_s22   ;;  %p56_p13 = scmp.eq.s32.totalorder %s653_s7, 0 }
  0x27   : > { %p1280_p12 = pnand %p665_p10, %p176_p11  ;;  %p66_p0 = scmp.eq.s32.totalorder %s1245_s26, 0 }
  0x28   : > { %s143_s25 = scalar_lea.hbm %s1500_s0, %s661_s18  ;;  %s68_s29 = sadd.s32 1, %s1104_s14 }
  0x29   : > { %s144_s28 = sshll.u32 %s143_s25, 4  ;;  %p75_p1 = scmp.ne.s32.totalorder %s1104_s14, %s1100_s13  ;;  %s145_s28 = int_to_ptr.hbm [resolvable:$true] %s144_s28 }
  0x2a   : > { %773 = dma.hbm_to_vmem [thread:$0]  (!%p771_p9), %s145_s28, 256, %s147_s2, %s132_s19, %s1138_s23, %s1139_s27, %s1140_s4  }
  0x2b   : > { %p1293_p3 = por %p56_p13, %p55_p5  ;;  %p81_p4 = scmp.ne.s32.totalorder %s1100_s13, %s1096_s12 }
  0x2c   : > { %s1300_s2 = scalar_select %p66_p0, %s1104_s14, %s68_s29  }
  0x2d   : > { %p1304_p7 = por %p75_p1, %p50_p2  ;;  %p1308_p8 = por %p81_p4, %p56_p13 }
  0x2e   : > { %p104_p9 = scmp.ne.s32.totalorder %s1092_s11, %s1088_s10  ;;  %p105_p10 = scmp.eq.s32.totalorder %s653_s7, 3 }
  0x2f   : > { %p110_p5 = scmp.ne.s32.totalorder %s1088_s10, %s1084_s9  ;;  %p111_p11 = scmp.eq.s32.totalorder %s654_s8, 3 }
  0x30   : > { %p1316_p6 = por %p105_p10, %p104_p9  ;;  %s156_s12 = sand.u32 1, %s1104_s14  }
  0x31   : > { %p1321_p0 = por %p111_p11, %p110_p5  ;;  %s662_s28 = sshll.u32 %s156_s12, 7 }
  0x32   : > { %s741_s19 = sshll.u32 %s1128_s20, 7  ;;  %s160_s0 = scalar_lea.vmem [#allocation8], %s662_s28 }
  0x33   : > { %s165_s4 = scalar_lea.hbm %s1483_s1, %s741_s19  ;;  %s168_s7 = sshll.u32 %s160_s0, 4  ;;  %s169_s7 = int_to_ptr.vmem [resolvable:$true] %s168_s7 }
  0x34   : > { %s166_s29 = sshll.u32 %s165_s4, 4  ;;  %p1507_p2 = scmp.lt.s32.totalorder %s1136_s22, 4  ;;  %s167_s29 = int_to_ptr.hbm [resolvable:$true] %s166_s29 }
  0x35   : > { %s157_s8 = scalar_lea.sflag [#allocation9], %s156_s12  ;;  %s1141_s24 = smov 64  }
  0x36   : > { %p774_p13 = pnand %p1507_p2, %p1304_p7  ;;  %s1142_s21 = smov 4  }
  0x37   : > { %180 = sbr.rel (%p1280_p12) target bundleno = 652 (0x28c), region = 28  ;;  %s182_s20 = sand.u32 (!%p1280_p12), 1, %s1112_s16  }
  0x38   : > { %776 = dma.hbm_to_vmem [thread:$0]  (!%p774_p13), %s167_s29, 2048, %s169_s7, %s157_s8, %s1141_s24, %s1141_s24, %s1142_s21  }
  0x39   : > { %s1336_s23 = sshll.u32 (!%p1280_p12), %s182_s20, 4  ;;  %s183_s28 = scalar_lea.sflag (!%p1280_p12), [#allocation6], %s182_s20 }
  0x3a   : > { %s186_s0 = scalar_lea.vmem (!%p1280_p12), [#allocation5], %s1336_s23 }
  0x3c   : > { %1071 = dma.done.wait (%p1293_p3), %s183_s28, 256  }
  0x3d   : > { %1073 = vsyncadd (%p1293_p3), %s183_s28, 4294967040  ;;  %s192_s3 = sand.u32 1, %s1100_s13  }
  0x3e   : > { %s667_s21 = sshll.u32 %s192_s3, 7  ;;  %s193_s24 = scalar_lea.sflag [#allocation9], %s192_s3 }
  0x3f   : > { %s1344_s18 = scalar_lea.vmem [#allocation8], %s667_s21 }
  0x40   : > { %1075 = dma.done.wait (%p1308_p8), %s193_s24, 2048  }
  0x41   : > { %1077 = vsyncadd (%p1308_p8), %s193_s24, 4294965248  ;;  %s220_s20 = sand.u32 1, %s1088_s10   ;;  %s1508_s19 = sld [smem:[#allocation14_spill]] }
  0x42   : > { %s1353_s12 = sshll.u32 %s220_s20, 3 }
  0x43   : > { %s222_s30 = scalar_lea.vmem [#allocation10], %s1353_s12 }
  0x47   : > { %p669_p12 = scmp.ne.s32.totalorder %s1508_s19, 0 }
  0x49   : > { %230 = sbr.rel (%p669_p12) target bundleno = 85 (0x55), region = 40 }
  0x4e   : > { %vm231_vm0 = vcmask 7168   ;;  %v1143_v0 = vmov -inf   ;;  %v1144_v1 = vmov 0.0  }
  0x4f   : > { %232 = vst.msk [vmem:[#allocation2] sm:$0xff] %vm231_vm0, %v1143_v0 }
  0x50   : > { %233 = vst.msk [vmem:[#allocation2 + $0x8] sm:$0xff] %vm231_vm0, %v1143_v0 }
  0x51   : > { %234 = vst.msk [vmem:[#allocation3] sm:$0xff] %vm231_vm0, %v1144_v1 }
  0x52   : > { %235 = vst.msk [vmem:[#allocation3 + $0x8] sm:$0xff] %vm231_vm0, %v1144_v1 }
  0x53   : > { %236 = vst [vmem:[#allocation4] sm:$0xff] %v1144_v1 }
  0x54   : > { %237 = vst [vmem:[#allocation4 + $0x8] sm:$0xff] %v1144_v1 }
  0x55 PF: > { %v1357_v2 = vld [vmem:[%s186_s0] sm:$0xff]  ;;  %v1361_v5 = vld [vmem:[%s186_s0 + $0x8] sm:$0xff]  ;;  %v1145_v10 = vmov 0   ;;  %vm294_vm1 = vcmask 7168   ;;  %s1509_s25 = sld [smem:[#allocation14_spill]] }
  0x56   : > { %v240_v3 = vunpack.c.l.bf16 %v1357_v2  ;;  %v241_v4 = vunpack.c.h.bf16 %v1357_v2  ;;  %v242_v7 = vunpack.c.l.bf16 %v1361_v5  ;;  %v243_v8 = vunpack.c.h.bf16 %v1361_v5  ;;  %906 = vset.pattern.permute.xlu1 %v1145_v10  ;;  %907 = vset.pattern.permute.xlu2 %v1145_v10  ;;  %v244_v11 = vld [vmem:[#allocation2] sm:$0xff]  ;;  %v749_v23 = vld [vmem:[%s1344_s18 + $0x38] sm:$0xff]  ;;  %v747_v27 = vld [vmem:[%s1344_s18 + $0x28] sm:$0xff] }
  0x57   : > { %908 = vset.pattern.permute.xlu0 %v1145_v10  ;;  %v245_v16 = vld [vmem:[#allocation2 + $0x8] sm:$0xff]  ;;  %441 = vmatpush.bf16.msra.mxu0 %v749_v23  ;;  %v748_v25 = vld [vmem:[%s1344_s18 + $0x30] sm:$0xff]  ;;  %v755_v28 = vld [vmem:[%s1344_s18 + $0x68] sm:$0xff] }
  0x58   : > { %v246_v6 = vmax.f32 %v240_v3, %v241_v4  ;;  %v249_v9 = vmax.f32 %v242_v7, %v243_v8  ;;  %v757_v24 = vld [vmem:[%s1344_s18 + $0x78] sm:$0xff]  ;;  %v756_v26 = vld [vmem:[%s1344_s18 + $0x70] sm:$0xff]  ;;  %v746_v29 = vld [vmem:[%s1344_s18 + $0x20] sm:$0xff] }
  0x59   : > { %455 = vmatpush.bf16.msra.mxu1 %v757_v24  ;;  %v754_v30 = vld [vmem:[%s1344_s18 + $0x60] sm:$0xff]  ;;  %v745_v31 = vld [vmem:[%s1344_s18 + $0x18] sm:$0xff]  ;;  %v744_v33 = vld [vmem:[%s1344_s18 + $0x10] sm:$0xff] }
  0x5a   : > { %247 = vmax.xlane.f32.xlu0 %v246_v6  ;;  %v753_v32 = vld [vmem:[%s1344_s18 + $0x58] sm:$0xff]  ;;  %v752_v34 = vld [vmem:[%s1344_s18 + $0x50] sm:$0xff]  ;;  %v743_v35 = vld [vmem:[%s1344_s18 + $0x8] sm:$0xff] }
  0x5b   : > { %442 = vmatpush.bf16.msra.mxu0 %v748_v25  ;;  %v751_v36 = vld [vmem:[%s1344_s18 + $0x48] sm:$0xff]  ;;  %v742_v37 = vld [vmem:[%s1344_s18] sm:$0xff]  ;;  %v297_v2 = vld [vmem:[#allocation4] sm:$0xff]  ;;  %p734_p1 = scmp.ne.s32.totalorder %s1509_s25, 1 }
  0x5c   : > { %v750_v38 = vld [vmem:[%s1344_s18 + $0x40] sm:$0xff]  ;;  %v283_v61 = vld [vmem:[#allocation3 + $0x8] sm:$0xff] }
  0x5d   : > { %456 = vmatpush.bf16.msra.mxu1 %v756_v26  ;;  %v282_v57 = vld [vmem:[#allocation3] sm:$0xff] }
  0x5f   : > { %443 = vmatpush.bf16.msra.mxu0 %v747_v27 }
  0x61   : > { %457 = vmatpush.bf16.msra.mxu1 %v755_v28 }
  0x62   : > { %250 = vmax.xlane.f32.xlu0 %v249_v9 }
  0x63   : > { %444 = vmatpush.bf16.msra.mxu0 %v746_v29 }
  0x65   : > { %458 = vmatpush.bf16.msra.mxu1 %v754_v30 }
  0x67   : > { %445 = vmatpush.bf16.msra.mxu0 %v745_v31 }
  0x69   : > { %459 = vmatpush.bf16.msra.mxu1 %v753_v32 }
  0x6b   : > { %446 = vmatpush.bf16.msra.mxu0 %v744_v33 }
  0x6d   : > { %460 = vmatpush.bf16.msra.mxu1 %v752_v34 }
  0x6f   : > { %447 = vmatpush.bf16.msra.mxu0 %v743_v35 }
  0x71   : > { %461 = vmatpush.bf16.msra.mxu1 %v751_v36 }
  0x73   : > { %448 = vmatpush.bf16.msra.mxu0 %v742_v37 }
  0x75   : > { %462 = vmatpush.bf16.msra.mxu1 %v750_v38 }
  0xcd   : > { %v248_v12 = vpop.xlane.xlu0 %247 }
  0xce   : > { %v252_v13 = vmax.f32 %v244_v11, %v248_v12 }
  0xd0   : > { %v254_v14 = vsub.f32 %v244_v11, %v252_v13  ;;  %473 = vst.msk [vmem:[#allocation2] sm:$0xff] %vm294_vm1, %v252_v13  ;;  %262 = vperm.xlu1 %906, %v252_v13  }
  0xd2   : > { %v256_v15 = vmul.f32 1.442695, %v254_v14 }
  0xd4   : > { %909 = vpow2.f32 %v256_v15 }
  0xd5   : > { %v251_v17 = vpop.xlane.xlu0 %250 }
  0xd6   : > { %v253_v18 = vmax.f32 %v245_v16, %v251_v17 }
  0xd8   : > { %v255_v19 = vsub.f32 %v245_v16, %v253_v18  ;;  %474 = vst.msk [vmem:[#allocation2 + $0x8] sm:$0xff] %vm294_vm1, %v253_v18  ;;  %267 = vperm.xlu1 %906, %v253_v18  }
  0xda   : > { %v1375_v20 = vpop.eup %909  ;;  %v258_v21 = vmul.f32 1.442695, %v255_v19 }
  0xdb   : > { %301 = vperm.xlu2 %907, %v1375_v20   ;;  %v284_v58 = vmul.f32 %v1375_v20, %v282_v57 }
  0xdc   : > { %911 = vpow2.f32 %v258_v21 }
  0xe2   : > { %v1378_v22 = vpop.eup %911 }
  0xe3   : > { %306 = vperm.xlu2 %907, %v1378_v22   ;;  %v285_v62 = vmul.f32 %v1378_v22, %v283_v61 }
 0x135   : > { %v302_v1 = vpop.permute.xlu2 %301 }
 0x136   : > { %v309_v5 = vmul.f32 %v302_v1, %v297_v2 }
 0x13d   : > { %v307_v9 = vpop.permute.xlu2 %306 }
 0x142   : > { %v263_v39 = vpop.permute.xlu1 %262 }
 0x143   : > { %v270_v40 = vsub.f32 %v240_v3, %v263_v39  ;;  %v271_v41 = vsub.f32 %v241_v4, %v263_v39 }
 0x145   : > { %v274_v42 = vmul.f32 1.442695, %v270_v40  ;;  %v276_v43 = vmul.f32 1.442695, %v271_v41 }
 0x147   : > { %913 = vpow2.f32 %v274_v42 }
 0x148   : > { %915 = vpow2.f32 %v276_v43 }
 0x14a   : > { %v268_v44 = vpop.permute.xlu1 %267 }
 0x14b   : > { %v272_v45 = vsub.f32 %v242_v7, %v268_v44  ;;  %v273_v46 = vsub.f32 %v243_v8, %v268_v44  ;;  %v298_v8 = vld [vmem:[#allocation4 + $0x8] sm:$0xff] }
 0x14c   : > { %v310_v12 = vmul.f32 %v307_v9, %v298_v8 }
 0x14d   : > { %v914_v47 = vpop.eup %913  ;;  %v278_v48 = vmul.f32 1.442695, %v272_v45  ;;  %v280_v49 = vmul.f32 1.442695, %v273_v46 }
 0x14e   : > { %v916_v50 = vpop.eup %915 }
 0x14f   : > { %917 = vpow2.f32 %v278_v48  ;;  %v286_v51 = vadd.f32 %v916_v50, %v914_v47 }
 0x150   : > { %919 = vpow2.f32 %v280_v49 }
 0x151   : > { %287 = vadd.xlane.f32.xlu0 %v286_v51 }
 0x155   : > { %v918_v52 = vpop.eup %917 }
 0x156   : > { %v920_v53 = vpop.eup %919  ;;  %v311_v54 = vpack.c.bf16 %v918_v52, %v914_v47 }
 0x157   : > { %v312_v55 = vpack.c.bf16 %v920_v53, %v916_v50  ;;  %v289_v56 = vadd.f32 %v920_v53, %v918_v52 }
 0x158   : > { %449 = vmatmul.bf16.vlgmr.msra.gmra.mxu0 %v311_v54 }
 0x159   : > { %463 = vmatmul.bf16.vlgmr.msra.gmra.mxu1 %v312_v55  ;;  %290 = vadd.xlane.f32.xlu1 %v289_v56 }
 0x1c4   : > { %v288_v59 = vpop.xlane.xlu0 %287 }
 0x1c5   : > { %v292_v60 = vadd.f32 %v288_v59, %v284_v58 }
 0x1c7   : > { %295 = vst.msk [vmem:[#allocation3] sm:$0xff] %vm294_vm1, %v292_v60 }
 0x1cc   : > { %v291_v63 = vpop.xlane.xlu1 %290 }
 0x1cd   : > { %v293_v0 = vadd.f32 %v291_v63, %v285_v62 }
 0x1cf   : > { %296 = vst.msk [vmem:[#allocation3 + $0x8] sm:$0xff] %vm294_vm1, %v293_v0 }
 0x1d5   : > { %v450_v3 = vpop.f32.mrf.mxu0 }
 0x1d6   : > { %v464_v4 = vpop.f32.mrf.mxu1 }
 0x1d7   : > { %v465_v6 = vadd.f32 %v464_v4, %v450_v3 }
 0x1d9   : > { %v469_v7 = vadd.f32 %v465_v6, %v309_v5 }
 0x1db   : > { %471 = vst [vmem:[#allocation4] sm:$0xff] %v469_v7 }
 0x1dd   : > { %v452_v10 = vpop.f32.mrf.mxu0 }
 0x1de   : > { %v466_v11 = vpop.f32.mrf.mxu1 }
 0x1df   : > { %v467_v13 = vadd.f32 %v466_v11, %v452_v10  ;;  %478 = sbr.rel (%p734_p1) target bundleno = 630 (0x276), region = 44 }
 0x1e1   : > { %v470_v14 = vadd.f32 %v467_v13, %v310_v12 }
 0x1e3   : > { %472 = vst [vmem:[#allocation4 + $0x8] sm:$0xff] %v470_v14 }
 0x1e4   : > { %v479_v15 = vld [vmem:[#allocation3] sm:$0xff]  ;;  %v480_v16 = vld [vmem:[#allocation3 + $0x8] sm:$0xff]  ;;  %v1146_v17 = vmov 0   ;;  %v509_v39 = vld [vmem:[#allocation4] sm:$0xff] }
 0x1e5   : > { %921 = vset.pattern.permute.xlu0 %v1146_v17  ;;  %922 = vrcp.f32 %v479_v15  ;;  %v492_v21 = vand.u32 2147483648, %v479_v15  ;;  %vm486_vm2 = vweird.f32 %v479_v15  ;;  %v490_v24 = vand.u32 2147483647, %v479_v15 }
 0x1e6   : > { %924 = vrcp.f32 %v480_v16  ;;  %vm500_vm6 = vweird.f32 %v480_v16  ;;  %v506_v30 = vand.u32 2147483648, %v480_v16  ;;  %v504_v33 = vand.u32 2147483647, %v480_v16 }
 0x1e7   : > { %v493_v27 = vor.u32 1.1754944e-38, %v492_v21  ;;  %vm491_vm5 = vcmp.eq.f32.partialorder %v490_v24, 8.507059e+37 }
 0x1e8   : > { %v507_v35 = vor.u32 1.1754944e-38, %v506_v30  ;;  %vm505_vm9 = vcmp.eq.f32.partialorder %v504_v33, 8.507059e+37 }
 0x1ea   : > { %v510_v40 = vld [vmem:[#allocation4 + $0x8] sm:$0xff] }
 0x1eb   : > { %v923_v18 = vpop.eup %922 }
 0x1ec   : > { %v925_v19 = vpop.eup %924  ;;  %v482_v20 = vmul.f32 %v923_v18, %v479_v15  ;;  %vm487_vm3 = vweird.f32 %v923_v18 }
 0x1ed   : > { %v496_v22 = vmul.f32 %v925_v19, %v480_v16  ;;  %vm488_vm4 = vmor %vm486_vm2, %vm487_vm3  ;;  %vm501_vm7 = vweird.f32 %v925_v19 }
 0x1ee   : > { %v483_v23 = vsub.f32 1.0, %v482_v20  ;;  %vm502_vm8 = vmor %vm500_vm6, %vm501_vm7 }
 0x1ef   : > { %v497_v25 = vsub.f32 1.0, %v496_v22 }
 0x1f0   : > { %v484_v26 = vmul.f32 %v923_v18, %v483_v23 }
 0x1f1   : > { %v498_v28 = vmul.f32 %v925_v19, %v497_v25 }
 0x1f2   : > { %v485_v29 = vadd.f32 %v923_v18, %v484_v26 }
 0x1f3   : > { %v499_v32 = vadd.f32 %v925_v19, %v498_v28 }
 0x1f4   : > { %v489_v31 = vsel %vm488_vm4, %v923_v18, %v485_v29 }
 0x1f5   : > { %v494_v34 = vsel %vm491_vm5, %v493_v27, %v489_v31  ;;  %v503_v36 = vsel %vm502_vm8, %v925_v19, %v499_v32 }
 0x1f6   : > { %513 = vperm.xlu0 %921, %v494_v34   ;;  %v508_v37 = vsel %vm505_vm9, %v507_v35, %v503_v36 }
 0x1fe   : > { %518 = vperm.xlu0 %921, %v508_v37  }
 0x268   : > { %v514_v38 = vpop.permute.xlu0 %513 }
 0x269   : > { %v521_v42 = vmul.f32 %v514_v38, %v509_v39 }
 0x270   : > { %v519_v41 = vpop.permute.xlu0 %518 }
 0x271   : > { %v522_v43 = vmul.f32 %v519_v41, %v510_v40 }
 0x273   : > { %v762_v44 = vpack.c.bf16 %v522_v43, %v521_v42 }
 0x275   : > { %763 = vst [vmem:[%s222_s30] sm:$0xff] %v762_v44  }
 0x276 PF: > { %s1510_s27 = sld [smem:[#allocation15_spill]]  ;;  %s540_s28 = sshll.u32 %s222_s30, 4  ;;  %s541_s28 = int_to_ptr.vmem [resolvable:$true] %s540_s28 }
 0x277   : > { %s1511_s8 = sld [smem:[#allocation21_spill]]  ;;  %s528_s3 = scalar_lea.sflag [#allocation7], %s220_s20 }
 0x27c   : > { %s758_s4 = sshll.u32 %s1510_s27, 3 }
 0x27d   : > { %s539_s23 = scalar_lea.hbm %s1511_s8, %s758_s4  ;;  %s1006_s25 = scalar_lea.hbm %s1511_s8, 16 }
 0x27e   : > { %s542_s0 = sshll.u32 %s539_s23, 4  ;;  %s543_s0 = int_to_ptr.hbm [resolvable:$true] %s542_s0 }
 0x27f   : > { %s1000_s21 = sshra.s32 %s543_s0, 4  ;;  %s1001_s21 = int_to_ptr.hbm [resolvable:$true] %s1000_s21 }
 0x280   : > { %s1002_s24 = scalar_lea.hbm %s1001_s21, 8  ;;  %p1007_p8 = scmp.lt.s32.totalorder %s1001_s21, %s1511_s8 }
 0x281   : > { %p1003_p3 = scmp.ne.s32.totalorder %s1001_s21, %s1002_s24  ;;  %p1008_p9 = scmp.lt.s32.totalorder %s1006_s25, %s1002_s24 }
 0x283   : > { %p1004_p4 = pnand %p1003_p3, %p1316_p6  ;;  %p1009_p10 = por %p1008_p9, %p1007_p8 }
 0x285   : > { %p1005_p7 = pneg %p1004_p4 }
 0x287   : > { %p1010_p5 = pnand %p1009_p10, %p1005_p7 }
 0x289   : > { %1013 = shalt.err (!%p1010_p5)
}
 0x28a   : > { %s1147_s20 = smov 64   ;;  %s1148_s12 = smov 4  }
 0x28b   : > { %768 = dma.vmem_to_hbm [thread:$0]  (%p1316_p6), %s541_s28, 128, %s543_s0, %s528_s3, %s1147_s20, %s1147_s20, %s1148_s12  }
 0x28c PF: > { %p782_p11 = scmp.ge.s32.totalorder %s1136_s22, 2  ;;  %s557_s30 = sand.u32 1, %s1084_s9  }
 0x28d   : > { %s558_s29 = scalar_lea.sflag [#allocation7], %s557_s30 }
 0x28e   : > { %p778_p2 = pnand %p782_p11, %p1321_p0 }
 0x290   : > { %p779_p13 = pneg %p778_p2 }
 0x292   : > { %1079 = dma.done.wait (%p779_p13), %s558_s29, 128  }
 0x293   : > { %1081 = vsyncadd (%p779_p13), %s558_s29, 4294967168  ;;  %s21_s22 = sadd.s32 1, %s1136_s22   ;;  %s1513_s18 = sld [smem:[#allocation16_spill]] }
 0x294   : > { %p1435_p12 = scmp.ge.s32.totalorder %s21_s22, 6   ;;  %s1514_s19 = sld [smem:[#allocation17_spill]] }
 0x295   : > { %s1515_s20 = sld [smem:[#allocation18_spill]]  ;;  %s1517_s9 = smov %s1088_s10 }
 0x296   : > { %s1516_s21 = sld [smem:[#allocation19_spill]]  ;;  %s1518_s10 = smov %s1092_s11 }
 0x297   : > { %s1519_s11 = smov %s1264_s5  ;;  %s1520_s12 = smov %s1100_s13 }
 0x298   : > { %s1521_s13 = smov %s1104_s14  ;;  %s1522_s14 = smov %s1300_s2 }
 0x299   : > { %s1523_s15 = smov %s1112_s16  ;;  %s1524_s16 = smov %s1116_s17 }
 0x29a   : > { %s1525_s17 = smov %s1267_s6  ;;  %20 = sbr.rel (!%p1435_p12) target bundleno = 15 (0xf), region = 94 }
 0x29f   :  { %564 = vsyncpa [#allocation6], 1 }
 0x2a0   :  { %566 = vsyncpa [#allocation6 + $0x1], 1 }
 0x2a1   :  { %567 = vsyncpa [#allocation9], 1 }
 0x2a2   :  { %569 = vsyncpa [#allocation9 + $0x1], 1 }
 0x2a3   :  { %570 = vsyncpa [#allocation7], 1 }
 0x2a4   :  { %572 = vsyncpa [#allocation7 + $0x1], 1 }

</bundles_post_ra>
